<compile_context>
chip_gen: v7x
topology: tpu7x:2x2x1
jax: 0.10.0
libtpu: 0.0.40
codegen_flags: <defaults>
</compile_context>

<pallas_src>
import numpy as np
import jax
import jax.numpy as jnp
from jax import lax
from jax.experimental import pallas as pl
from jax.experimental.pallas import tpu as pltpu


# --------------------------------------------------------------------------
# kernel factory (all sizes are static Python ints -> fully unrolled body)
# --------------------------------------------------------------------------
def _make_kernel(window_sizes, lens, eps, bt, row_chunk):
    """Fused pyramid max-pool + concat + LayerNorm over a 2-D row slab.

    x_ref : (bt*L,    D)  level-0 rows for `bt` batch elements
    g_ref : (1, D)        LayerNorm gamma (f32)
    b_ref : (1, D)        LayerNorm beta  (f32)
    o_ref : (bt*Ltot, D)  output rows, [lvl0 | lvl1 | lvl2 | lvl3] per slab
    """
    L0 = lens[0]
    Ltot = sum(lens)

    def kernel(x_ref, g_ref, b_ref, o_ref):
        gamma = g_ref[...]          # (1, D) f32, loaded once
        beta = b_ref[...]           # (1, D) f32, loaded once

        for b in range(bt):
            xoff = b * L0
            ooff = b * Ltot

            # ---- level 0: the raw input (the torch "transpose" is only a
            #      layout choice: channels on lanes, sequence on sublanes) ----
            o_ref[ooff:ooff + L0, :] = x_ref[xoff:xoff + L0, :]

            # ---- level 1: MaxPool1d(w0), strided loads straight from x_ref
            #      (avoids re-reading the rows just written to o_ref) ----
            w = window_sizes[0]
            n = lens[1]
            pooled = x_ref[pl.ds(xoff, n, stride=w), :]
            for j in range(1, w):
                pooled = jnp.maximum(
                    pooled, x_ref[pl.ds(xoff + j, n, stride=w), :])
            dst = ooff + L0
            o_ref[dst:dst + n, :] = pooled
            src = dst

            # ---- levels 2..3: pool the previous level out of o_ref ----
            for lvl in range(1, len(window_sizes)):
                w = window_sizes[lvl]
                cur = lens[lvl]
                n = lens[lvl + 1]
                dst = src + cur
                pooled = o_ref[pl.ds(src, n, stride=w), :]
                for j in range(1, w):
                    pooled = jnp.maximum(
                        pooled, o_ref[pl.ds(src + j, n, stride=w), :])
                o_ref[dst:dst + n, :] = pooled
                src = dst

        # ---- LayerNorm over the channel (lane) axis, in place on o_ref,
        #      chunked over row tiles so temporaries fit the vreg file ----
        total = bt * Ltot
        for r0 in range(0, total, row_chunk):
            rlen = min(row_chunk, total - r0)
            y = o_ref[r0:r0 + rlen, :].astype(jnp.float32)
            mean = jnp.mean(y, axis=-1, keepdims=True)
            cen = y - mean
            var = jnp.mean(cen * cen, axis=-1, keepdims=True)   # biased, like nn.LayerNorm
            inv = lax.rsqrt(var + eps)
            o_ref[r0:r0 + rlen, :] = ((cen * inv) * gamma + beta).astype(o_ref.dtype)

    return kernel


# --------------------------------------------------------------------------
# helpers
# --------------------------------------------------------------------------
def _pool_lengths(L, ws):
    lens = [L]
    for w in ws:
        lens.append(lens[-1] // w)      # MaxPool1d default stride == kernel
    return lens


def _choose_bt(B, L, Ltot, D, itemsize):
    """Batch elements per grid step for the flat 2-D layout.

    Targets ~2 MiB per-step tiles, keeps >= 2 grid steps when B >= 2
    (megacore / 2 TCs on v7x), requires B % bt == 0 and 8-sublane-aligned
    block rows. Returns 0 if no aligned choice exists (caller falls back).
    """
    per_b = (L + Ltot) * D * itemsize
    cap = max(1, int((2 << 20) // max(per_b, 1)))
    cap = min(cap, B)
    if B >= 2:
        cap = min(cap, B // 2)
    cap = max(cap, 1)
    for bt in range(cap, 0, -1):
        if B % bt == 0 and (bt * L) % 8 == 0 and (bt * Ltot) % 8 == 0:
            return bt
    return 0


# --------------------------------------------------------------------------
# wrapper
# --------------------------------------------------------------------------
def max_pooling_construct(enc_input, gamma, beta, window_size, eps=1e-5):
    """Pallas TPU forward of MaxPooling_Construct.

    enc_input : (B, L, d_model)  float32 or bfloat16 (output keeps the dtype)
    gamma, beta : (d_model,)     LayerNorm affine parameters
    window_size : int or list of 3 ints
    returns : (B, L + L//w0 + L//(w0*w1) + L//(w0*w1*w2), d_model)
    """
    B, L, D = enc_input.shape
    if isinstance(window_size, (list, tuple)):
        ws = [int(w) for w in window_size]
    else:
        ws = [int(window_size)] * 3
    assert len(ws) == 3, "module uses exactly three pooling layers"

    lens = _pool_lengths(L, ws)
    Ltot = sum(lens)
    out_dtype = enc_input.dtype
    itemsize = jnp.dtype(out_dtype).itemsize

    gamma2 = jnp.reshape(gamma.astype(jnp.float32), (1, D))
    beta2 = jnp.reshape(beta.astype(jnp.float32), (1, D))

    # LayerNorm row-chunk: bounded vreg pressure, multiple of 8 sublanes.
    row_chunk = max(8, min(512, ((32 * 1024) // max(D, 1)) // 8 * 8))

    bt = _choose_bt(B, L, Ltot, D, itemsize)

    if bt > 0:
        # Flat 2-D layout: (B, L, D) -> (B*L, D) and (B*Ltot, D) are free,
        # contiguous reshapes; one grid step processes `bt` batch slabs.
        kernel = _make_kernel(tuple(ws), tuple(lens), float(eps), bt, row_chunk)
        in_bytes = bt * L * D * itemsize
        out_bytes = bt * Ltot * D * itemsize
        vmem_limit = int(min(64 << 20,
                             max(2 * (in_bytes + out_bytes) + (4 << 20),
                                 16 << 20)))
        out2 = pl.pallas_call(
            kernel,
            out_shape=jax.ShapeDtypeStruct((B * Ltot, D), out_dtype),
            grid=(B // bt,),
            in_specs=[
                pl.BlockSpec((bt * L, D), lambda i: (i, 0)),
                pl.BlockSpec((1, D), lambda i: (0, 0)),   # gamma: constant block
                pl.BlockSpec((1, D), lambda i: (0, 0)),   # beta : constant block
            ],
            out_specs=pl.BlockSpec((bt * Ltot, D), lambda i: (i, 0)),
            compiler_params=pltpu.CompilerParams(
                dimension_semantics=("parallel",),
                vmem_limit_bytes=vmem_limit),
        )(jnp.reshape(enc_input, (B * L, D)), gamma2, beta2)
        return jnp.reshape(out2, (B, Ltot, D))

    # Fallback: one batch element per grid step, batch dim squeezed out so the
    # kernel still sees 2-D refs (used when L or Ltot is not 8-row aligned and
    # the flat 2-D block shape would violate the (8, 128) block constraint —
    # here the block's last two dims equal the full array dims, so any L works).
    kernel = _make_kernel(tuple(ws), tuple(lens), float(eps), 1, row_chunk)
    in_bytes = L * D * itemsize
    out_bytes = Ltot * D * itemsize
    vmem_limit = int(min(64 << 20,
                         max(2 * (in_bytes + out_bytes) + (4 << 20),
                             16 << 20)))
    return pl.pallas_call(
        kernel,
        out_shape=jax.ShapeDtypeStruct((B, Ltot, D), out_dtype),
        grid=(B,),
        in_specs=[
            pl.BlockSpec((None, L, D), lambda b: (b, 0, 0)),
            pl.BlockSpec((1, D), lambda b: (0, 0)),
            pl.BlockSpec((1, D), lambda b: (0, 0)),
        ],
        out_specs=pl.BlockSpec((None, Ltot, D), lambda b: (b, 0, 0)),
        compiler_params=pltpu.CompilerParams(
            dimension_semantics=("parallel",),
            vmem_limit_bytes=vmem_limit),
    )(enc_input, gamma2, beta2)


# --------------------------------------------------------------------------
# numpy reference (mirrors the PyTorch forward exactly)
# --------------------------------------------------------------------------
def reference_forward(x, gamma, beta, window_size, eps=1e-5):
    x = np.asarray(x, dtype=np.float64)
    gamma = np.asarray(gamma, dtype=np.float64)
    beta = np.asarray(beta, dtype=np.float64)
    B, L, D = x.shape
    ws = (list(window_size) if isinstance(window_size, (list, tuple))
          else [window_size] * 3)

    cur = np.transpose(x, (0, 2, 1))                         # (B, D, L)
    alls = [cur]
    for w in ws:
        Lc = cur.shape[-1]
        Lo = Lc // w
        cur = cur[:, :, :Lo * w].reshape(B, D, Lo, w).max(axis=-1)
        alls.append(cur)
    cat = np.concatenate(alls, axis=2).transpose(0, 2, 1)    # (B, Ltot, D)
    mean = cat.mean(axis=-1, keepdims=True)
    var = cat.var(axis=-1, keepdims=True)                    # biased variance
    return (cat - mean) / np.sqrt(var + eps) * gamma + beta


# --------------------------------------------------------------------------
if __name__ == "__main__":
    root = jax.random.PRNGKey(0)

    cases = [
        # (B, L, d_model, window_size, dtype, rtol, atol)
        (2, 64, 32,  2,         jnp.float32,  1e-4, 1e-5),   # flat path, grid=2
        (2, 64, 32,  [4, 2, 2], jnp.float32,  1e-4, 1e-5),   # Ltot=92 -> squeezed fallback
        (8, 64, 128, [2, 2, 2], jnp.bfloat16, 2e-2, 5e-2),   # batched (bt=4), lane-dense, bf16 I/O
    ]

    for idx, (B, L, D, wsz, dtype, rtol, atol) in enumerate(cases):
        kx, kg, kb = jax.random.split(jax.random.fold_in(root, idx), 3)
        x = jax.random.normal(kx, (B, L, D), dtype=jnp.float32).astype(dtype)
        # nn.LayerNorm initializes weight=1, bias=0; perturb so the affine
        # path is exercised.
        gamma = 1.0 + 0.1 * jax.random.normal(kg, (D,), dtype=jnp.float32)
        beta = 0.1 * jax.random.normal(kb, (D,), dtype=jnp.float32)

        out = jax.block_until_ready(max_pooling_construct(x, gamma, beta, wsz))
        ref = reference_forward(np.asarray(x.astype(jnp.float32)), gamma, beta, wsz)

        assert out.dtype == dtype, (out.dtype, dtype)
        assert out.shape == ref.shape, (out.shape, ref.shape)
        np.testing.assert_allclose(
            np.asarray(out.astype(jnp.float32), dtype=np.float64), ref,
            rtol=rtol, atol=atol)

    print("KERNEL_OK")
</pallas_src>

<mosaic_0001>
module attributes {stable_mosaic.version = 11 : i64} {
  func.func @kernel(%arg0: i32, %arg1: memref<64x32xf32, #tpu.memory_space<vmem>>, %arg2: memref<1x32xf32, #tpu.memory_space<vmem>>, %arg3: memref<1x32xf32, #tpu.memory_space<vmem>>, %arg4: memref<120x32xf32, #tpu.memory_space<vmem>>) attributes {dimension_semantics = [#tpu.dimension_semantics<parallel>], iteration_bounds = array<i64: 2>, scalar_prefetch = 0 : i64, scratch_operands = 0 : i64, tpu.core_type = #tpu.core_type<tc>, window_params = [{transform_indices = @transform_0, window_bounds = array<i64: 64, 32>}, {pipeline_mode = #tpu.pipeline_mode<synchronous>, transform_indices = @transform_1, window_bounds = array<i64: 1, 32>}, {pipeline_mode = #tpu.pipeline_mode<synchronous>, transform_indices = @transform_2, window_bounds = array<i64: 1, 32>}, {transform_indices = @transform_3, window_bounds = array<i64: 120, 32>}]} {
    %c0 = arith.constant 0 : index
    %c0_0 = arith.constant 0 : index
    %0 = vector.load %arg2[%c0, %c0_0] : memref<1x32xf32, #tpu.memory_space<vmem>>, vector<1x32xf32>
    %c0_1 = arith.constant 0 : index
    %c0_2 = arith.constant 0 : index
    %1 = vector.load %arg3[%c0_1, %c0_2] : memref<1x32xf32, #tpu.memory_space<vmem>>, vector<1x32xf32>
    %c0_3 = arith.constant 0 : index
    %c0_4 = arith.constant 0 : index
    %2 = vector.load %arg1[%c0_3, %c0_4] : memref<64x32xf32, #tpu.memory_space<vmem>>, vector<64x32xf32>
    %c0_5 = arith.constant 0 : index
    %c0_6 = arith.constant 0 : index
    %3 = vector.load %arg4[%c0_5, %c0_6] : memref<120x32xf32, #tpu.memory_space<vmem>>, vector<64x32xf32>
    tpu.vector_store %arg4[%c0_5, %c0_6], %2 {strides = array<i32>} : memref<120x32xf32, #tpu.memory_space<vmem>>, vector<64x32xf32>,
    %c0_7 = arith.constant 0 : index
    %c0_8 = arith.constant 0 : index
    %4 = tpu.strided_load %arg1[%c0_7, %c0_8] {strides = array<i32: 2, 1>} : memref<64x32xf32, #tpu.memory_space<vmem>>, vector<32x32xf32>
    %c1 = arith.constant 1 : index
    %c0_9 = arith.constant 0 : index
    %5 = tpu.strided_load %arg1[%c1, %c0_9] {strides = array<i32: 2, 1>} : memref<64x32xf32, #tpu.memory_space<vmem>>, vector<32x32xf32>
    %6 = arith.maximumf %4, %5 : vector<32x32xf32>
    %c64 = arith.constant 64 : index
    %c0_10 = arith.constant 0 : index
    %7 = vector.load %arg4[%c64, %c0_10] : memref<120x32xf32, #tpu.memory_space<vmem>>, vector<32x32xf32>
    tpu.vector_store %arg4[%c64, %c0_10], %6 {strides = array<i32>} : memref<120x32xf32, #tpu.memory_space<vmem>>, vector<32x32xf32>,
    %c64_11 = arith.constant 64 : index
    %c0_12 = arith.constant 0 : index
    %8 = tpu.strided_load %arg4[%c64_11, %c0_12] {strides = array<i32: 2, 1>} : memref<120x32xf32, #tpu.memory_space<vmem>>, vector<16x32xf32>
    %c65 = arith.constant 65 : index
    %c0_13 = arith.constant 0 : index
    %9 = tpu.strided_load %arg4[%c65, %c0_13] {strides = array<i32: 2, 1>} : memref<120x32xf32, #tpu.memory_space<vmem>>, vector<16x32xf32>
    %10 = arith.maximumf %8, %9 : vector<16x32xf32>
    %c96 = arith.constant 96 : index
    %c0_14 = arith.constant 0 : index
    %11 = vector.load %arg4[%c96, %c0_14] : memref<120x32xf32, #tpu.memory_space<vmem>>, vector<16x32xf32>
    tpu.vector_store %arg4[%c96, %c0_14], %10 {strides = array<i32>} : memref<120x32xf32, #tpu.memory_space<vmem>>, vector<16x32xf32>,
    %c96_15 = arith.constant 96 : index
    %c0_16 = arith.constant 0 : index
    %12 = tpu.strided_load %arg4[%c96_15, %c0_16] {strides = array<i32: 2, 1>} : memref<120x32xf32, #tpu.memory_space<vmem>>, vector<8x32xf32>
    %c97 = arith.constant 97 : index
    %c0_17 = arith.constant 0 : index
    %13 = tpu.strided_load %arg4[%c97, %c0_17] {strides = array<i32: 2, 1>} : memref<120x32xf32, #tpu.memory_space<vmem>>, vector<8x32xf32>
    %14 = arith.maximumf %12, %13 : vector<8x32xf32>
    %c112 = arith.constant 112 : index
    %c0_18 = arith.constant 0 : index
    %15 = vector.load %arg4[%c112, %c0_18] : memref<120x32xf32, #tpu.memory_space<vmem>>, vector<8x32xf32>
    tpu.vector_store %arg4[%c112, %c0_18], %14 {strides = array<i32>} : memref<120x32xf32, #tpu.memory_space<vmem>>, vector<8x32xf32>,
    %c0_19 = arith.constant 0 : index
    %c0_20 = arith.constant 0 : index
    %16 = vector.load %arg4[%c0_19, %c0_20] : memref<120x32xf32, #tpu.memory_space<vmem>>, vector<120x32xf32>
    %cst = arith.constant dense<0.000000e+00> : vector<120xf32>
    %17 = vector.multi_reduction <add>, %16, %cst [1] : vector<120x32xf32> to vector<120xf32>
    %18 = vector.shape_cast %17 : vector<120xf32> to vector<120x1xf32>
    %cst_21 = arith.constant 3.200000e+01 : f32
    %19 = vector.broadcast %cst_21 : f32 to vector<120x1xf32>
    %20 = arith.divf %18, %19 : vector<120x1xf32>
    %21 = vector.broadcast %20 : vector<120x1xf32> to vector<120x32xf32>
    %22 = arith.subf %16, %21 : vector<120x32xf32>
    %23 = arith.mulf %22, %22 : vector<120x32xf32>
    %cst_22 = arith.constant dense<0.000000e+00> : vector<120xf32>
    %24 = vector.multi_reduction <add>, %23, %cst_22 [1] : vector<120x32xf32> to vector<120xf32>
    %25 = vector.shape_cast %24 : vector<120xf32> to vector<120x1xf32>
    %cst_23 = arith.constant 3.200000e+01 : f32
    %26 = vector.broadcast %cst_23 : f32 to vector<120x1xf32>
    %27 = arith.divf %25, %26 : vector<120x1xf32>
    %cst_24 = arith.constant 9.99999974E-6 : f32
    %28 = vector.broadcast %cst_24 : f32 to vector<120x1xf32>
    %29 = arith.addf %27, %28 : vector<120x1xf32>
    %30 = math.rsqrt %29 : vector<120x1xf32>
    %31 = vector.broadcast %30 : vector<120x1xf32> to vector<120x32xf32>
    %32 = arith.mulf %22, %31 : vector<120x32xf32>
    %33 = vector.broadcast %0 : vector<1x32xf32> to vector<120x32xf32>
    %34 = arith.mulf %32, %33 : vector<120x32xf32>
    %35 = vector.broadcast %1 : vector<1x32xf32> to vector<120x32xf32>
    %36 = arith.addf %34, %35 : vector<120x32xf32>
    %c0_25 = arith.constant 0 : index
    %c0_26 = arith.constant 0 : index
    %37 = vector.load %arg4[%c0_25, %c0_26] : memref<120x32xf32, #tpu.memory_space<vmem>>, vector<120x32xf32>
    tpu.vector_store %arg4[%c0_25, %c0_26], %36 {strides = array<i32>} : memref<120x32xf32, #tpu.memory_space<vmem>>, vector<120x32xf32>,
    return
  }
  func.func @transform_0(%arg0: i32) -> (i32, i32) {
    %c0_i32 = arith.constant 0 : i32
    %c0_i32_0 = arith.constant 0 : i32
    return %arg0, %c0_i32 : i32, i32
  }
  func.func @transform_1(%arg0: i32) -> (i32, i32) {
    %c0_i32 = arith.constant 0 : i32
    %c0_i32_0 = arith.constant 0 : i32
    %c0_i32_1 = arith.constant 0 : i32
    return %c0_i32, %c0_i32_0 : i32, i32
  }
  func.func @transform_2(%arg0: i32) -> (i32, i32) {
    %c0_i32 = arith.constant 0 : i32
    %c0_i32_0 = arith.constant 0 : i32
    %c0_i32_1 = arith.constant 0 : i32
    return %c0_i32, %c0_i32_0 : i32, i32
  }
  func.func @transform_3(%arg0: i32) -> (i32, i32) {
    %c0_i32 = arith.constant 0 : i32
    %c0_i32_0 = arith.constant 0 : i32
    return %arg0, %c0_i32 : i32, i32
  }
}

</mosaic_0001>

<bundles_post_ra>
// kernel: tpu_custom_call.1
= control target key start
LH: loop header
LB: loop body
LE: loop exit
PB: predicated region body
PF: predicated region fallthrough
CT: control target
= control target key end

     0   :  { %s649_s12 = smov 0   ;;  %s946_s0 = inlined_call_operand.vmem [shape: f32[128,32], index: 0, kind: input, shape index: {}]   ;;  %s947_s1 = inlined_call_operand.vmem [shape: f32[1,32], index: 1, kind: input, shape index: {}]   ;;  %s948_s2 = inlined_call_operand.vmem [shape: f32[1,32], index: 2, kind: input, shape index: {}]   ;;  %s949_s3 = inlined_call_operand.vmem [shape: f32[240,32], index: 3, kind: output, shape index: {}]  }
   0x1 LB: > { %s558_s13 = sadd.s32 4294967295, %s627_s12   ;;  %p562_p0 = scmp.ge.s32.totalorder %s627_s12, 1  ;;  %s627_s12 = sphi %s649_s12, %s13_s12  }
   0x2   : > { %p138_p1 = scmp.lt.s32.totalorder %s627_s12, 3 }
   0x4   : > { %p139_p2 = pnand %p562_p0, %p138_p1 }
   0x5   : > { %s563_s14 = sshll.u32 (!%p139_p2), %s558_s13, 3  ;;  %s168_s15 = smul.u32 (!%p139_p2), 15, %s558_s13  ;;  %vm184_vm0 = vcmask (!%p139_p2), 261120  }
   0x6   : > { %142 = sbr.rel (%p139_p2) target bundleno = 368 (0x170), region = 32  ;;  %p163_p3 = scmp.lt.s32.totalorder (!%p139_p2), %s563_s14, 15 }
   0x7   : > { %p169_p4 = scmp.lt.s32.totalorder (!%p139_p2), %s168_s15, 29 }
   0xd   : > { %s951_s14 = smov (!%p163_p3, %s563_s14), 15  ;;  %s953_s15 = smov (!%p169_p4, %s168_s15), 29 }
   0xe   : > { %s564_s16 = sshll.u32 %s951_s14, 3  ;;  %s565_s20 = sshll.u32 %s953_s15, 3 }
   0xf   : > { %s166_s19 = scalar_lea.vmem %s946_s0, %s564_s16  ;;  %s663_s23 = scalar_lea.vmem %s949_s3, %s565_s20 }
  0x10   : > { %v176_v0 = vld [vmem:[%s166_s19] sm:$0xff]  ;;  %v178_v1 = vld [vmem:[%s166_s19 + $0x10] sm:$0xff]  ;;  %v177_v2 = vld [vmem:[%s166_s19 + $0x8] sm:$0xff] }
  0x11   : > { %185 = vst.msk [vmem:[%s663_s23] sm:$0xff] %vm184_vm0, %v176_v0  ;;  %187 = vst.msk [vmem:[%s663_s23 + $0x10] sm:$0xff] %vm184_vm0, %v178_v1  ;;  %v179_v3 = vld [vmem:[%s166_s19 + $0x18] sm:$0xff]  ;;  %v180_v4 = vld [vmem:[%s166_s19 + $0x20] sm:$0xff] }
  0x12   : > { %186 = vst.msk [vmem:[%s663_s23 + $0x8] sm:$0xff] %vm184_vm0, %v177_v2  ;;  %v181_v5 = vld [vmem:[%s166_s19 + $0x28] sm:$0xff]  ;;  %188 = vst.msk [vmem:[%s663_s23 + $0x18] sm:$0xff] %vm184_vm0, %v179_v3  ;;  %v182_v6 = vld [vmem:[%s166_s19 + $0x30] sm:$0xff] }
  0x13   : > { %189 = vst.msk [vmem:[%s663_s23 + $0x20] sm:$0xff] %vm184_vm0, %v180_v4  ;;  %190 = vst.msk [vmem:[%s663_s23 + $0x28] sm:$0xff] %vm184_vm0, %v181_v5  ;;  %v183_v7 = vld [vmem:[%s166_s19 + $0x38] sm:$0xff]  ;;  %v193_v8 = vld [vmem:[%s166_s19] ss:$2 sm:$0xff] }
  0x14   : > { %191 = vst.msk [vmem:[%s663_s23 + $0x30] sm:$0xff] %vm184_vm0, %v182_v6  ;;  %192 = vst.msk [vmem:[%s663_s23 + $0x38] sm:$0xff] %vm184_vm0, %v183_v7  ;;  %v569_v9 = vld [vmem:[%s166_s19 + $0x1] ss:$2 sm:$0xff]  ;;  %v566_v10 = vld [vmem:[%s166_s19 + $0x10] ss:$2 sm:$0xff] }
  0x15   : > { %v570_v11 = vld [vmem:[%s166_s19 + $0x11] ss:$2 sm:$0xff]  ;;  %v208_v12 = vmax.f32 %v193_v8, %v569_v9  ;;  %v567_v14 = vld [vmem:[%s166_s19 + $0x20] ss:$2 sm:$0xff]  ;;  %v571_v15 = vld [vmem:[%s166_s19 + $0x21] ss:$2 sm:$0xff] }
  0x16   : > { %v209_v13 = vmax.f32 %v566_v10, %v570_v11  ;;  %v568_v16 = vld [vmem:[%s166_s19 + $0x30] ss:$2 sm:$0xff]  ;;  %v210_v17 = vmax.f32 %v567_v14, %v571_v15  ;;  %v572_v18 = vld [vmem:[%s166_s19 + $0x31] ss:$2 sm:$0xff] }
  0x17   : > { %212 = vst.msk [vmem:[%s663_s23 + $0x40] sm:$0xff] %vm184_vm0, %v208_v12  ;;  %v211_v19 = vmax.f32 %v568_v16, %v572_v18 }
  0x18   : > { %213 = vst.msk [vmem:[%s663_s23 + $0x48] sm:$0xff] %vm184_vm0, %v209_v13  ;;  %214 = vst.msk [vmem:[%s663_s23 + $0x50] sm:$0xff] %vm184_vm0, %v210_v17  ;;  %v234_v20 = vld [vmem:[%s663_s23] sm:$0xff]  ;;  %v236_v21 = vld [vmem:[%s663_s23 + $0x10] sm:$0xff] }
  0x19   : > { %v690_v22 = vld [vmem:[%s663_s23 + $0x8] sm:$0xff]  ;;  %215 = vst.msk [vmem:[%s663_s23 + $0x58] sm:$0xff] %vm184_vm0, %v211_v19  ;;  %v249_v23 = vsel %vm184_vm0, %v234_v20, 0.0  ;;  %v255_v24 = vsel %vm184_vm0, %v236_v21, 0.0  ;;  %v697_v25 = vld [vmem:[%s663_s23 + $0x18] sm:$0xff] }
  0x1a   : > { %250 = vadd.xlane.f32.xlu0 %v249_v23  ;;  %256 = vadd.xlane.f32.xlu1 %v255_v24  ;;  %v252_v26 = vsel %vm184_vm0, %v690_v22, 0.0  ;;  %v258_v27 = vsel %vm184_vm0, %v697_v25, 0.0  ;;  %v704_v28 = vld [vmem:[%s663_s23 + $0x20] sm:$0xff]  ;;  %v707_v29 = vld [vmem:[%s663_s23 + $0x28] sm:$0xff] }
  0x1b   : > { %v261_v32 = vsel %vm184_vm0, %v704_v28, 0.0  ;;  %v264_v33 = vsel %vm184_vm0, %v707_v29, 0.0  ;;  %v718_v37 = vld [vmem:[%s663_s23 + $0x30] sm:$0xff]  ;;  %v721_v38 = vld [vmem:[%s663_s23 + $0x38] sm:$0xff] }
  0x1c   : > { %v267_v40 = vsel %vm184_vm0, %v718_v37, 0.0  ;;  %v270_v41 = vsel %vm184_vm0, %v721_v38, 0.0 }
  0x1e   : > { %253 = vadd.xlane.f32.xlu0 %v252_v26  ;;  %259 = vadd.xlane.f32.xlu1 %v258_v27  ;;  %v732_v42 = vld [vmem:[%s663_s23 + $0x40] sm:$0xff] }
  0x1f   : > { %v573_v30 = vld [vmem:[%s663_s23 + $0x40] ss:$2 sm:$0xff]  ;;  %v575_v31 = vld [vmem:[%s663_s23 + $0x41] ss:$2 sm:$0xff]  ;;  %v273_v44 = vsel %vm184_vm0, %v732_v42, 0.0  ;;  %v742_v46 = vld [vmem:[%s663_s23 + $0x50] sm:$0xff] }
  0x20   : > { %v224_v34 = vmax.f32 %v573_v30, %v575_v31  ;;  %v574_v35 = vld [vmem:[%s663_s23 + $0x50] ss:$2 sm:$0xff]  ;;  %v576_v36 = vld [vmem:[%s663_s23 + $0x51] ss:$2 sm:$0xff]  ;;  %v735_v43 = vld [vmem:[%s663_s23 + $0x48] sm:$0xff]  ;;  %v279_v51 = vsel %vm184_vm0, %v742_v46, 0.0 }
  0x21   : > { %v225_v39 = vmax.f32 %v574_v35, %v576_v36  ;;  %v276_v45 = vsel %vm184_vm0, %v735_v43, 0.0  ;;  %v745_v47 = vld [vmem:[%s663_s23 + $0x58] sm:$0xff] }
  0x22   : > { %226 = vst.msk [vmem:[%s663_s23 + $0x60] sm:$0xff] %vm184_vm0, %v224_v34  ;;  %262 = vadd.xlane.f32.xlu0 %v261_v32  ;;  %265 = vadd.xlane.f32.xlu1 %v264_v33  ;;  %v282_v52 = vsel %vm184_vm0, %v745_v47, 0.0 }
  0x23   : > { %227 = vst.msk [vmem:[%s663_s23 + $0x68] sm:$0xff] %vm184_vm0, %v225_v39 }
  0x26   : > { %268 = vadd.xlane.f32.xlu0 %v267_v40  ;;  %271 = vadd.xlane.f32.xlu1 %v270_v41 }
  0x29   : > { %v754_v53 = vld [vmem:[%s663_s23 + $0x60] sm:$0xff] }
  0x2a   : > { %v577_v48 = vld [vmem:[%s663_s23 + $0x60] ss:$2 sm:$0xff]  ;;  %v578_v49 = vld [vmem:[%s663_s23 + $0x61] ss:$2 sm:$0xff]  ;;  %274 = vadd.xlane.f32.xlu0 %v273_v44  ;;  %277 = vadd.xlane.f32.xlu1 %v276_v45  ;;  %v285_v55 = vsel %vm184_vm0, %v754_v53, 0.0 }
  0x2b   : > { %v232_v50 = vmax.f32 %v577_v48, %v578_v49  ;;  %v757_v54 = vld [vmem:[%s663_s23 + $0x68] sm:$0xff] }
  0x2c   : > { %v288_v56 = vsel %vm184_vm0, %v757_v54, 0.0 }
  0x2d   : > { %233 = vst.msk [vmem:[%s663_s23 + $0x70] sm:$0xff] %vm184_vm0, %v232_v50 }
  0x2e   : > { %280 = vadd.xlane.f32.xlu0 %v279_v51  ;;  %283 = vadd.xlane.f32.xlu1 %v282_v52 }
  0x32   : > { %286 = vadd.xlane.f32.xlu0 %v285_v55  ;;  %289 = vadd.xlane.f32.xlu1 %v288_v56 }
  0x34   : > { %v766_v57 = vld [vmem:[%s663_s23 + $0x70] sm:$0xff] }
  0x35   : > { %v291_v58 = vsel %vm184_vm0, %v766_v57, 0.0 }
  0x36   : > { %292 = vadd.xlane.f32.xlu0 %v291_v58 }
  0xa7   : > { %v251_v59 = vpop.xlane.xlu0 %250  ;;  %v257_v60 = vpop.xlane.xlu1 %256 }
  0xa8   : > { %v295_v61 = vmul.f32 0.03125, %v251_v59  ;;  %v297_v62 = vmul.f32 0.03125, %v257_v60 }
  0xaa   : > { %v770_v63 = vsub.f32 %v234_v20, %v295_v61  ;;  %v772_v0 = vsub.f32 %v236_v21, %v297_v62 }
  0xab   : > { %v254_v1 = vpop.xlane.xlu0 %253  ;;  %v260_v2 = vpop.xlane.xlu1 %259 }
  0xac   : > { %v296_v3 = vmul.f32 0.03125, %v254_v1  ;;  %v298_v4 = vmul.f32 0.03125, %v260_v2  ;;  %v325_v5 = vmul.f32 %v770_v63, %v770_v63  ;;  %v327_v6 = vmul.f32 %v772_v0, %v772_v0 }
  0xae   : > { %v779_v7 = vsub.f32 %v690_v22, %v296_v3  ;;  %v782_v8 = vsub.f32 %v697_v25, %v298_v4  ;;  %v340_v9 = vsel %vm184_vm0, %v325_v5, 0.0  ;;  %v346_v12 = vsel %vm184_vm0, %v327_v6, 0.0 }
  0xaf   : > { %341 = vadd.xlane.f32.xlu1 %v340_v9  ;;  %v263_v10 = vpop.xlane.xlu0 %262  ;;  %v266_v11 = vpop.xlane.xlu1 %265 }
  0xb0   : > { %v299_v13 = vmul.f32 0.03125, %v263_v10  ;;  %v300_v14 = vmul.f32 0.03125, %v266_v11  ;;  %v326_v15 = vmul.f32 %v779_v7, %v779_v7  ;;  %v328_v16 = vmul.f32 %v782_v8, %v782_v8 }
  0xb2   : > { %v791_v17 = vsub.f32 %v704_v28, %v299_v13  ;;  %v794_v18 = vsub.f32 %v707_v29, %v300_v14  ;;  %v343_v19 = vsel %vm184_vm0, %v326_v15, 0.0  ;;  %v349_v22 = vsel %vm184_vm0, %v328_v16, 0.0 }
  0xb3   : > { %347 = vadd.xlane.f32.xlu1 %v346_v12  ;;  %344 = vadd.xlane.f32.xlu0 %v343_v19  ;;  %v269_v20 = vpop.xlane.xlu0 %268  ;;  %v272_v21 = vpop.xlane.xlu1 %271 }
  0xb4   : > { %v301_v23 = vmul.f32 0.03125, %v269_v20  ;;  %v302_v24 = vmul.f32 0.03125, %v272_v21  ;;  %v329_v25 = vmul.f32 %v791_v17, %v791_v17  ;;  %v330_v26 = vmul.f32 %v794_v18, %v794_v18 }
  0xb6   : > { %v803_v27 = vsub.f32 %v718_v37, %v301_v23  ;;  %v806_v28 = vsub.f32 %v721_v38, %v302_v24  ;;  %v352_v29 = vsel %vm184_vm0, %v329_v25, 0.0  ;;  %v355_v32 = vsel %vm184_vm0, %v330_v26, 0.0 }
  0xb7   : > { %350 = vadd.xlane.f32.xlu0 %v349_v22  ;;  %353 = vadd.xlane.f32.xlu1 %v352_v29  ;;  %v275_v30 = vpop.xlane.xlu0 %274  ;;  %v278_v31 = vpop.xlane.xlu1 %277 }
  0xb8   : > { %v303_v33 = vmul.f32 0.03125, %v275_v30  ;;  %v304_v34 = vmul.f32 0.03125, %v278_v31  ;;  %v331_v35 = vmul.f32 %v803_v27, %v803_v27  ;;  %v332_v36 = vmul.f32 %v806_v28, %v806_v28 }
  0xba   : > { %v815_v37 = vsub.f32 %v732_v42, %v303_v33  ;;  %v818_v38 = vsub.f32 %v735_v43, %v304_v34  ;;  %v358_v39 = vsel %vm184_vm0, %v331_v35, 0.0  ;;  %v361_v44 = vsel %vm184_vm0, %v332_v36, 0.0  ;;  %v861_v34 = vld [vmem:[%s947_s1] ss:$0 sm:$0xff] }
  0xbb   : > { %356 = vadd.xlane.f32.xlu0 %v355_v32  ;;  %359 = vadd.xlane.f32.xlu1 %v358_v39  ;;  %v281_v40 = vpop.xlane.xlu0 %280  ;;  %v284_v41 = vpop.xlane.xlu1 %283 }
  0xbc   : > { %v305_v45 = vmul.f32 0.03125, %v281_v40  ;;  %v306_v48 = vmul.f32 0.03125, %v284_v41  ;;  %v333_v49 = vmul.f32 %v815_v37, %v815_v37  ;;  %v334_v42 = vmul.f32 %v818_v38, %v818_v38 }
  0xbe   : > { %v827_v50 = vsub.f32 %v742_v46, %v305_v45  ;;  %v830_v43 = vsub.f32 %v745_v47, %v306_v48  ;;  %v364_v51 = vsel %vm184_vm0, %v333_v49, 0.0  ;;  %v367_v56 = vsel %vm184_vm0, %v334_v42, 0.0 }
  0xbf   : > { %362 = vadd.xlane.f32.xlu0 %v361_v44  ;;  %365 = vadd.xlane.f32.xlu1 %v364_v51  ;;  %v287_v52 = vpop.xlane.xlu0 %286  ;;  %v290_v55 = vpop.xlane.xlu1 %289  ;;  %v867_v44 = vld [vmem:[%s948_s2] ss:$0 sm:$0xff] }
  0xc0   : > { %v307_v58 = vmul.f32 0.03125, %v287_v52  ;;  %v308_v59 = vmul.f32 0.03125, %v290_v55  ;;  %v335_v60 = vmul.f32 %v827_v50, %v827_v50  ;;  %v336_v46 = vmul.f32 %v830_v43, %v830_v43 }
  0xc2   : > { %v839_v61 = vsub.f32 %v754_v53, %v307_v58  ;;  %v842_v47 = vsub.f32 %v757_v54, %v308_v59  ;;  %v370_v62 = vsel %vm184_vm0, %v335_v60, 0.0  ;;  %v373_v3 = vsel %vm184_vm0, %v336_v46, 0.0 }
  0xc3   : > { %368 = vadd.xlane.f32.xlu0 %v367_v56  ;;  %371 = vadd.xlane.f32.xlu1 %v370_v62  ;;  %v293_v1 = vpop.xlane.xlu0 %292 }
  0xc4   : > { %v309_v2 = vmul.f32 0.03125, %v293_v1  ;;  %v337_v4 = vmul.f32 %v839_v61, %v839_v61  ;;  %v338_v5 = vmul.f32 %v842_v47, %v842_v47 }
  0xc6   : > { %v851_v53 = vsub.f32 %v766_v57, %v309_v2  ;;  %v376_v54 = vsel %vm184_vm0, %v337_v4, 0.0  ;;  %v379_v6 = vsel %vm184_vm0, %v338_v5, 0.0 }
  0xc7   : > { %374 = vadd.xlane.f32.xlu0 %v373_v3  ;;  %377 = vadd.xlane.f32.xlu1 %v376_v54 }
  0xc8   : > { %v339_v9 = vmul.f32 %v851_v53, %v851_v53 }
  0xca   : > { %v382_v10 = vsel %vm184_vm0, %v339_v9, 0.0 }
  0xcb   : > { %380 = vadd.xlane.f32.xlu0 %v379_v6  ;;  %383 = vadd.xlane.f32.xlu1 %v382_v10 }
 0x13c   : > { %v342_v11 = vpop.xlane.xlu1 %341 }
 0x13d   : > { %v385_v12 = vmul.f32 0.03125, %v342_v11 }
 0x13f   : > { %v400_v13 = vadd.f32 1e-05, %v385_v12 }
 0x140   : > { %v348_v14 = vpop.xlane.xlu1 %347  ;;  %v345_v15 = vpop.xlane.xlu0 %344 }
 0x141   : > { %591 = vrsqrt.f32 %v400_v13  ;;  %v387_v57 = vmul.f32 0.03125, %v348_v14  ;;  %v386_v16 = vmul.f32 0.03125, %v345_v15 }
 0x143   : > { %v402_v19 = vadd.f32 1e-05, %v387_v57  ;;  %v401_v20 = vadd.f32 1e-05, %v386_v16 }
 0x144   : > { %v354_v21 = vpop.xlane.xlu1 %353  ;;  %v351_v22 = vpop.xlane.xlu0 %350 }
 0x145   : > { %593 = vrsqrt.f32 %v402_v19  ;;  %v389_v23 = vmul.f32 0.03125, %v354_v21  ;;  %v388_v24 = vmul.f32 0.03125, %v351_v22 }
 0x146   : > { %595 = vrsqrt.f32 %v401_v20 }
 0x147   : > { %v404_v25 = vadd.f32 1e-05, %v389_v23  ;;  %v403_v26 = vadd.f32 1e-05, %v388_v24 }
 0x148   : > { %v360_v29 = vpop.xlane.xlu1 %359  ;;  %v357_v30 = vpop.xlane.xlu0 %356 }
 0x149   : > { %597 = vrsqrt.f32 %v404_v25  ;;  %v391_v31 = vmul.f32 0.03125, %v360_v29  ;;  %v390_v32 = vmul.f32 0.03125, %v357_v30 }
 0x14a   : > { %599 = vrsqrt.f32 %v403_v26 }
 0x14b   : > { %v592_v33 = vpop.eup %591  ;;  %v406_v35 = vadd.f32 1e-05, %v391_v31  ;;  %v405_v36 = vadd.f32 1e-05, %v390_v32 }
 0x14c   : > { %v430_v39 = vmul.f32 %v592_v33, %v770_v63  ;;  %v366_v40 = vpop.xlane.xlu1 %365  ;;  %v363_v41 = vpop.xlane.xlu0 %362 }
 0x14d   : > { %601 = vrsqrt.f32 %v406_v35  ;;  %v393_v45 = vmul.f32 0.03125, %v366_v40  ;;  %v392_v48 = vmul.f32 0.03125, %v363_v41 }
 0x14e   : > { %v451_v49 = vmul.f32 %v861_v34, %v430_v39  ;;  %603 = vrsqrt.f32 %v405_v36 }
 0x14f   : > { %v594_v42 = vpop.eup %593  ;;  %v408_v51 = vadd.f32 1e-05, %v393_v45  ;;  %v407_v52 = vadd.f32 1e-05, %v392_v48 }
 0x150   : > { %v596_v55 = vpop.eup %595  ;;  %v472_v63 = vadd.f32 %v867_v44, %v451_v49  ;;  %v432_v56 = vmul.f32 %v594_v42, %v772_v0  ;;  %v372_v58 = vpop.xlane.xlu1 %371 }
 0x151   : > { %v369_v59 = vpop.xlane.xlu0 %368  ;;  %v431_v60 = vmul.f32 %v596_v55, %v779_v7  ;;  %605 = vrsqrt.f32 %v408_v51  ;;  %v395_v46 = vmul.f32 0.03125, %v372_v58 }
 0x152   : > { %v394_v62 = vmul.f32 0.03125, %v369_v59  ;;  %487 = vst.msk [vmem:[%s663_s23] sm:$0xff] %vm184_vm0, %v472_v63  ;;  %v453_v1 = vmul.f32 %v861_v34, %v432_v56  ;;  %607 = vrsqrt.f32 %v407_v52 }
 0x153   : > { %v598_v2 = vpop.eup %597  ;;  %v452_v3 = vmul.f32 %v861_v34, %v431_v60  ;;  %v410_v4 = vadd.f32 1e-05, %v395_v46 }
 0x154   : > { %v409_v5 = vadd.f32 1e-05, %v394_v62  ;;  %v600_v0 = vpop.eup %599  ;;  %v474_v54 = vadd.f32 %v867_v44, %v453_v1  ;;  %v434_v7 = vmul.f32 %v598_v2, %v791_v17  ;;  %v378_v6 = vpop.xlane.xlu1 %377 }
 0x155   : > { %v375_v9 = vpop.xlane.xlu0 %374  ;;  %v473_v10 = vadd.f32 %v867_v44, %v452_v3  ;;  %v433_v11 = vmul.f32 %v600_v0, %v782_v8  ;;  %609 = vrsqrt.f32 %v410_v4  ;;  %v397_v12 = vmul.f32 0.03125, %v378_v6 }
 0x156   : > { %489 = vst.msk [vmem:[%s663_s23 + $0x10] sm:$0xff] %vm184_vm0, %v474_v54  ;;  %v455_v13 = vmul.f32 %v861_v34, %v434_v7  ;;  %611 = vrsqrt.f32 %v409_v5  ;;  %v396_v14 = vmul.f32 0.03125, %v375_v9 }
 0x157   : > { %v602_v15 = vpop.eup %601  ;;  %488 = vst.msk [vmem:[%s663_s23 + $0x8] sm:$0xff] %vm184_vm0, %v473_v10  ;;  %v454_v17 = vmul.f32 %v861_v34, %v433_v11  ;;  %v412_v57 = vadd.f32 1e-05, %v397_v12 }
 0x158   : > { %v604_v16 = vpop.eup %603  ;;  %v476_v19 = vadd.f32 %v867_v44, %v455_v13  ;;  %v436_v8 = vmul.f32 %v602_v15, %v803_v27  ;;  %v411_v20 = vadd.f32 1e-05, %v396_v14  ;;  %v384_v21 = vpop.xlane.xlu1 %383 }
 0x159   : > { %v381_v22 = vpop.xlane.xlu0 %380  ;;  %v475_v23 = vadd.f32 %v867_v44, %v454_v17  ;;  %v435_v24 = vmul.f32 %v604_v16, %v794_v18  ;;  %613 = vrsqrt.f32 %v412_v57  ;;  %v399_v25 = vmul.f32 0.03125, %v384_v21 }
 0x15a   : > { %491 = vst.msk [vmem:[%s663_s23 + $0x20] sm:$0xff] %vm184_vm0, %v476_v19  ;;  %v457_v26 = vmul.f32 %v861_v34, %v436_v8  ;;  %615 = vrsqrt.f32 %v411_v20  ;;  %v398_v29 = vmul.f32 0.03125, %v381_v22 }
 0x15b   : > { %v606_v30 = vpop.eup %605  ;;  %490 = vst.msk [vmem:[%s663_s23 + $0x18] sm:$0xff] %vm184_vm0, %v475_v23  ;;  %v456_v27 = vmul.f32 %v861_v34, %v435_v24  ;;  %v414_v31 = vadd.f32 1e-05, %v399_v25 }
 0x15c   : > { %v608_v32 = vpop.eup %607  ;;  %v478_v33 = vadd.f32 %v867_v44, %v457_v26  ;;  %v438_v18 = vmul.f32 %v606_v30, %v815_v37  ;;  %v413_v35 = vadd.f32 1e-05, %v398_v29 }
 0x15d   : > { %v477_v36 = vadd.f32 %v867_v44, %v456_v27  ;;  %v437_v39 = vmul.f32 %v608_v32, %v806_v28  ;;  %617 = vrsqrt.f32 %v414_v31 }
 0x15e   : > { %493 = vst.msk [vmem:[%s663_s23 + $0x30] sm:$0xff] %vm184_vm0, %v478_v33  ;;  %v459_v40 = vmul.f32 %v861_v34, %v438_v18  ;;  %619 = vrsqrt.f32 %v413_v35 }
 0x15f   : > { %v610_v41 = vpop.eup %609  ;;  %492 = vst.msk [vmem:[%s663_s23 + $0x28] sm:$0xff] %vm184_vm0, %v477_v36  ;;  %v458_v45 = vmul.f32 %v861_v34, %v437_v39 }
 0x160   : > { %v612_v37 = vpop.eup %611  ;;  %v480_v48 = vadd.f32 %v867_v44, %v459_v40  ;;  %v440_v49 = vmul.f32 %v610_v41, %v827_v50 }
 0x161   : > { %v479_v28 = vadd.f32 %v867_v44, %v458_v45  ;;  %v439_v42 = vmul.f32 %v612_v37, %v818_v38 }
 0x162   : > { %495 = vst.msk [vmem:[%s663_s23 + $0x40] sm:$0xff] %vm184_vm0, %v480_v48  ;;  %v461_v51 = vmul.f32 %v861_v34, %v440_v49 }
 0x163   : > { %v614_v52 = vpop.eup %613  ;;  %494 = vst.msk [vmem:[%s663_s23 + $0x38] sm:$0xff] %vm184_vm0, %v479_v28  ;;  %v460_v55 = vmul.f32 %v861_v34, %v439_v42 }
 0x164   : > { %v616_v63 = vpop.eup %615  ;;  %v482_v56 = vadd.f32 %v867_v44, %v461_v51  ;;  %v442_v50 = vmul.f32 %v614_v52, %v839_v61 }
 0x165   : > { %v481_v58 = vadd.f32 %v867_v44, %v460_v55  ;;  %v441_v38 = vmul.f32 %v616_v63, %v830_v43 }
 0x166   : > { %497 = vst.msk [vmem:[%s663_s23 + $0x50] sm:$0xff] %vm184_vm0, %v482_v56  ;;  %v463_v59 = vmul.f32 %v861_v34, %v442_v50 }
 0x167   : > { %v618_v60 = vpop.eup %617  ;;  %496 = vst.msk [vmem:[%s663_s23 + $0x48] sm:$0xff] %vm184_vm0, %v481_v58  ;;  %v462_v46 = vmul.f32 %v861_v34, %v441_v38 }
 0x168   : > { %v620_v62 = vpop.eup %619  ;;  %v484_v1 = vadd.f32 %v867_v44, %v463_v59  ;;  %v444_v61 = vmul.f32 %v618_v60, %v851_v53 }
 0x169   : > { %v483_v2 = vadd.f32 %v867_v44, %v462_v46  ;;  %v443_v43 = vmul.f32 %v620_v62, %v842_v47 }
 0x16a   : > { %499 = vst.msk [vmem:[%s663_s23 + $0x60] sm:$0xff] %vm184_vm0, %v484_v1  ;;  %v465_v3 = vmul.f32 %v861_v34, %v444_v61 }
 0x16b   : > { %498 = vst.msk [vmem:[%s663_s23 + $0x58] sm:$0xff] %vm184_vm0, %v483_v2  ;;  %v464_v4 = vmul.f32 %v861_v34, %v443_v43 }
 0x16c   : > { %v486_v5 = vadd.f32 %v867_v44, %v465_v3 }
 0x16d   : > { %v485_v0 = vadd.f32 %v867_v44, %v464_v4 }
 0x16e   : > { %501 = vst.msk [vmem:[%s663_s23 + $0x70] sm:$0xff] %vm184_vm0, %v486_v5 }
 0x16f   : > { %500 = vst.msk [vmem:[%s663_s23 + $0x68] sm:$0xff] %vm184_vm0, %v485_v0 }
 0x170 PF: > { %s13_s12 = sadd.s32 1, %s627_s12  }
 0x171   : > { %p10_p5 = scmp.ge.s32.totalorder %s13_s12, 4  }
 0x173   :  { %12 = sbr.rel (!%p10_p5) target bundleno = 1 (0x1), region = 75 }

</bundles_post_ra>
